<compile_context>
chip_gen: v7x
topology: tpu7x:2x2x1
jax: 0.10.0
libtpu: 0.0.40
codegen_flags: <defaults>
</compile_context>

<pallas_src>
import functools
import math

import jax
import jax.numpy as jnp
from jax.experimental import pallas as pl
from jax.experimental.pallas import tpu as pltpu

NEG_INF = -1e30  # large-negative mask value (avoids inf arithmetic in online softmax)


# ----------------------------- helpers -----------------------------
def _round_up(x, m):
    return ((x + m - 1) // m) * m


def _pick_tile(dim, pref, align):
    """Pick a tile size: `pref` if dim is large, else dim rounded up to `align`."""
    if dim >= pref:
        return pref
    return _round_up(dim, align)


def _sublane_align(dtype):
    # bf16 packs two rows per sublane -> prefer 16-row granules; fp32 -> 8.
    return 16 if jnp.dtype(dtype) == jnp.dtype(jnp.bfloat16) else 8


# ----------------------------- tiled linear (matmul + bias) -----------------------------
def _linear_kernel(x_ref, w_ref, b_ref, o_ref, acc_ref):
    # x: (tm, tk), w: (tk, tn), b: (1, tn), o: (tm, tn); fp32 accumulation in VMEM scratch.
    @pl.when(pl.program_id(2) == 0)
    def _():
        acc_ref[...] = jnp.zeros(acc_ref.shape, jnp.float32)

    acc_ref[...] += jnp.dot(x_ref[...], w_ref[...], preferred_element_type=jnp.float32)

    @pl.when(pl.program_id(2) == pl.num_programs(2) - 1)
    def _():
        o_ref[...] = (acc_ref[...] + b_ref[...]).astype(o_ref.dtype)


def pallas_linear(x, w, b, *, compute_dtype=jnp.bfloat16, out_dtype=jnp.float32):
    """x: (M, K), w: (K, Nout), b: (Nout,) -> (M, Nout) in out_dtype."""
    M, K = x.shape
    K2, Nout = w.shape
    assert K2 == K

    # 512-wide tiles (measured: 256-wide ~63% of HBM roofline, 512-wide ~85%); full-K
    # contraction tile when K is small so the reduction grid axis collapses to one step.
    tm = _pick_tile(M, 512, _sublane_align(compute_dtype))
    tn = _pick_tile(Nout, 512, 128)
    tk = _round_up(K, 128) if K <= 1024 else 512
    Mp, Kp, Np = _round_up(M, tm), _round_up(K, tk), _round_up(Nout, tn)

    # TODO(synk): on v7x an fp8 compute_dtype for the projections (fp32 accumulation) could
    # roughly double MXU throughput; kept bf16/fp32 here pending accuracy validation.
    xp = x.astype(compute_dtype)
    wp = w.astype(compute_dtype)
    if (Mp, Kp) != (M, K):
        xp = jnp.pad(xp, ((0, Mp - M), (0, Kp - K)))
    if (Kp, Np) != (K, Nout):
        wp = jnp.pad(wp, ((0, Kp - K), (0, Np - Nout)))
    bp = b.astype(jnp.float32)
    if Np != Nout:
        bp = jnp.pad(bp, (0, Np - Nout))
    bp = bp.reshape(1, Np)

    out = pl.pallas_call(
        _linear_kernel,
        grid=(Mp // tm, Np // tn, Kp // tk),
        out_shape=jax.ShapeDtypeStruct((Mp, Np), out_dtype),
        in_specs=[
            pl.BlockSpec((tm, tk), lambda i, j, k: (i, k)),
            pl.BlockSpec((tk, tn), lambda i, j, k: (k, j)),
            pl.BlockSpec((1, tn), lambda i, j, k: (0, j)),
        ],
        out_specs=pl.BlockSpec((tm, tn), lambda i, j, k: (i, j)),
        scratch_shapes=[pltpu.VMEM((tm, tn), jnp.float32)],
        compiler_params=pltpu.CompilerParams(
            dimension_semantics=("parallel", "parallel", "arbitrary"),
            vmem_limit_bytes=32 * 1024 * 1024,
        ),
    )(xp, wp, bp)

    if (Mp, Np) != (M, Nout):
        out = out[:M, :Nout]
    return out


# ----------------------------- flash SDPA (no weights returned) -----------------------------
def _flash_kernel(q_ref, k_ref, v_ref, o_ref, m_scr, l_scr, acc_scr,
                  *, nheads, head_dim, kv_len, kv_tile, masked, approx):
    # q_ref: (tq, H, Dh); k_ref/v_ref: (tkv, H, Dh); o_ref: (tq, H*Dh) lane-dense.
    # scale already folded into the q projection weights.
    ki = pl.program_id(2)

    @pl.when(ki == 0)
    def _():
        m_scr[...] = jnp.full(m_scr.shape, NEG_INF, jnp.float32)
        l_scr[...] = jnp.zeros(l_scr.shape, jnp.float32)
        acc_scr[...] = jnp.zeros(acc_scr.shape, jnp.float32)

    if masked:
        # Tiny (1, tkv) column-validity mask (not a full (H, tq, tkv) iota/compare).
        col_ok = (ki * kv_tile
                  + jax.lax.broadcasted_iota(jnp.int32, (1, kv_tile), 1)) < kv_len

    for h in range(nheads):
        q_h = q_ref[:, h, :]                                   # (tq, Dh)
        k_h = k_ref[:, h, :]                                   # (tkv, Dh)
        v_h = v_ref[:, h, :]                                   # (tkv, Dh)

        s = jnp.dot(q_h, k_h.T, preferred_element_type=jnp.float32)  # (tq, tkv)
        if masked:
            s = jnp.where(col_ok, s, NEG_INF)

        m_prev = m_scr[h]                                      # (tq, 1)
        m_new = jnp.maximum(m_prev, jnp.max(s, axis=-1, keepdims=True))
        alpha = jnp.exp(m_prev - m_new)
        p = jnp.exp(s - m_new)
        l_scr[h] = alpha * l_scr[h] + jnp.sum(p, axis=-1, keepdims=True)
        acc_scr[h] = alpha * acc_scr[h] + jnp.dot(
            p.astype(v_h.dtype), v_h, preferred_element_type=jnp.float32)
        m_scr[h] = m_new

    @pl.when(ki == pl.num_programs(2) - 1)
    def _():
        for h in range(nheads):
            inv = pl.reciprocal(l_scr[h], approx=approx)
            o_ref[:, h * head_dim:(h + 1) * head_dim] = (
                acc_scr[h] * inv).astype(o_ref.dtype)


def pallas_flash_sdpa(qkv, *, nheads, head_dim, out_dtype=None,
                      q_tile_pref=256, kv_tile_pref=256):
    """qkv: (N, L, 3, H, Dh) packed projection output -> (N, L, H*Dh) attention output.

    tq/tkv default to 256/256 (good for v6e/v7x); pass kv_tile_pref=128 on v5e.
    TODO(synk): for H >= 32 on v7x, split heads over an extra grid axis to cap VMEM.
    """
    N, L, three, H, Dh = qkv.shape
    assert three == 3 and H == nheads and Dh == head_dim
    E = H * Dh
    align = _sublane_align(qkv.dtype)

    if L >= q_tile_pref and L >= kv_tile_pref:
        tq, tkv = q_tile_pref, kv_tile_pref
        big, small = max(tq, tkv), min(tq, tkv)
        assert big % small == 0, "tile prefs must divide each other"
        Lp = _round_up(L, big)
    else:
        tq = tkv = _round_up(min(L, min(q_tile_pref, kv_tile_pref)), align)
        Lp = _round_up(L, tq)

    if Lp != L:
        qkv = jnp.pad(qkv, ((0, 0), (0, Lp - L), (0, 0), (0, 0), (0, 0)))
    out_dtype = out_dtype or qkv.dtype
    approx = jnp.dtype(qkv.dtype) != jnp.dtype(jnp.float32)

    kernel = functools.partial(
        _flash_kernel, nheads=H, head_dim=Dh, kv_len=L, kv_tile=tkv,
        masked=(Lp != L), approx=approx)

    # NOTE: if profiling shows exposed DMA at small kv tiles, add
    # pipeline_mode=pl.Buffered(3) to the k/v BlockSpecs.
    o = pl.pallas_call(
        kernel,
        grid=(N, Lp // tq, Lp // tkv),
        out_shape=jax.ShapeDtypeStruct((N, Lp, E), out_dtype),
        in_specs=[
            pl.BlockSpec((None, tq, None, H, Dh), lambda n, qi, ki: (n, qi, 0, 0, 0)),
            pl.BlockSpec((None, tkv, None, H, Dh), lambda n, qi, ki: (n, ki, 1, 0, 0)),
            pl.BlockSpec((None, tkv, None, H, Dh), lambda n, qi, ki: (n, ki, 2, 0, 0)),
        ],
        out_specs=pl.BlockSpec((None, tq, E), lambda n, qi, ki: (n, qi, 0)),
        scratch_shapes=[
            pltpu.VMEM((H, tq, 1), jnp.float32),    # running max
            pltpu.VMEM((H, tq, 1), jnp.float32),    # running denom
            pltpu.VMEM((H, tq, Dh), jnp.float32),   # output accumulator
        ],
        compiler_params=pltpu.CompilerParams(
            dimension_semantics=("parallel", "parallel", "arbitrary"),
            vmem_limit_bytes=32 * 1024 * 1024,
        ),
    )(qkv, qkv, qkv)

    if Lp != L:
        o = o[:, :L, :]
    return o


# ----------------------------- SDPA with attention weights (debug path) -----------------------------
def _sdpa_weights_kernel(q_ref, k_ref, v_ref, o_ref, w_ref,
                         *, nheads, head_dim, kv_len, masked):
    # q_ref: (tq, H, Dh); k_ref/v_ref: (Lp, H, Dh); o_ref: (tq, H*Dh); w_ref: (H, tq, Lp).
    if masked:
        col_ok = jax.lax.broadcasted_iota(jnp.int32, (1, k_ref.shape[0]), 1) < kv_len

    for h in range(nheads):
        q_h = q_ref[:, h, :]
        k_h = k_ref[:, h, :]
        v_h = v_ref[:, h, :]

        s = jnp.dot(q_h, k_h.T, preferred_element_type=jnp.float32)  # (tq, Lp)
        if masked:
            s = jnp.where(col_ok, s, NEG_INF)

        m = jnp.max(s, axis=-1, keepdims=True)
        e = jnp.exp(s - m)
        denom = jnp.sum(e, axis=-1, keepdims=True)
        p = e / denom  # exact fp32 division -> returned weights sum to 1

        w_ref[h] = p
        o_ref[:, h * head_dim:(h + 1) * head_dim] = jnp.dot(
            p.astype(v_h.dtype), v_h,
            preferred_element_type=jnp.float32).astype(o_ref.dtype)


def pallas_sdpa_with_weights(qkv, *, nheads, head_dim, out_dtype=None, seq_tile_pref=128):
    """Debug path: also materializes the (N, H, Lq, Lkv) fp32 attention-weight tensor.
    Holds full-length K/V per step; not intended for long sequences / perf runs."""
    N, L, three, H, Dh = qkv.shape
    assert three == 3 and H == nheads and Dh == head_dim
    E = H * Dh
    align = _sublane_align(qkv.dtype)
    t = _pick_tile(L, seq_tile_pref, align)
    Lp = _round_up(L, t)

    if Lp != L:
        qkv = jnp.pad(qkv, ((0, 0), (0, Lp - L), (0, 0), (0, 0), (0, 0)))
    out_dtype = out_dtype or qkv.dtype

    kernel = functools.partial(_sdpa_weights_kernel, nheads=H, head_dim=Dh,
                               kv_len=L, masked=(Lp != L))
    o, w = pl.pallas_call(
        kernel,
        grid=(N, Lp // t),
        out_shape=(
            jax.ShapeDtypeStruct((N, Lp, E), out_dtype),
            jax.ShapeDtypeStruct((N, H, Lp, Lp), jnp.float32),
        ),
        in_specs=[
            pl.BlockSpec((None, t, None, H, Dh), lambda n, qi: (n, qi, 0, 0, 0)),
            pl.BlockSpec((None, Lp, None, H, Dh), lambda n, qi: (n, 0, 1, 0, 0)),
            pl.BlockSpec((None, Lp, None, H, Dh), lambda n, qi: (n, 0, 2, 0, 0)),
        ],
        out_specs=(
            pl.BlockSpec((None, t, E), lambda n, qi: (n, qi, 0)),
            pl.BlockSpec((None, H, t, Lp), lambda n, qi: (n, 0, qi, 0)),
        ),
        compiler_params=pltpu.CompilerParams(
            dimension_semantics=("parallel", "parallel"),
            vmem_limit_bytes=32 * 1024 * 1024,
        ),
    )(qkv, qkv, qkv)

    if Lp != L:
        o = o[:, :L, :]
        w = w[:, :, :L, :L]
    return o, w


# ----------------------------- module -----------------------------
class MyMultiHeadAttentionPallas:
    """Mirrors MyMultiHeadAttention with E_q == E_k == E_v (packed projection),
    activation='softmax', dropout=0.0, is_causal=False, attn_mask=None.

    compute_dtype controls the MXU input dtype of all matmuls (fp32 accumulation either
    way); default bf16 diverges from PyTorch's fp32 nn.Linear — pass jnp.float32 for
    bit-closer results. need_weights defaults to False (flash path); True uses the
    O(L^2)-materializing debug kernel, matching the PyTorch module's returned weights."""

    def __init__(self, E_q, E_total, nheads, key, compute_dtype=jnp.bfloat16):
        assert E_total % nheads == 0
        self.nheads = nheads
        self.E_head = E_total // nheads
        self.E_q = E_q
        self.E_total = E_total
        self.compute_dtype = compute_dtype

        k1, k2, k3, k4 = jax.random.split(key, 4)
        # nn.Linear default init: U(-1/sqrt(fan_in), 1/sqrt(fan_in)); deterministic synthetic init.
        bnd_in = 1.0 / math.sqrt(E_q)
        # stored as (in, out) so kernels compute x @ W (+ b); params kept fp32.
        self.packed_w = jax.random.uniform(
            k1, (E_q, 3 * E_total), jnp.float32, -bnd_in, bnd_in)
        self.packed_b = jax.random.uniform(
            k2, (3 * E_total,), jnp.float32, -bnd_in, bnd_in)
        bnd_out = 1.0 / math.sqrt(E_total)
        self.out_w = jax.random.uniform(
            k3, (E_total, E_q), jnp.float32, -bnd_out, bnd_out)
        self.out_b = jax.random.uniform(k4, (E_q,), jnp.float32, -bnd_out, bnd_out)

        # Fold the 1/sqrt(head_dim) softmax scale into the q third of the packed projection
        # (removes a full-tile multiply from every kv step of the SDPA kernel).
        scale = 1.0 / math.sqrt(self.E_head)
        col_scale = jnp.concatenate(
            [jnp.full((E_total,), scale, jnp.float32),
             jnp.ones((2 * E_total,), jnp.float32)])
        self.packed_w_sdpa = self.packed_w * col_scale[None, :]
        self.packed_b_sdpa = self.packed_b * col_scale

    def __call__(self, x, need_weights=False):
        # x: (N, L, E_q); self-attention (query is key is value branch of forward()).
        N, L, E_q = x.shape
        H, Dh, E_total = self.nheads, self.E_head, self.E_total
        cdt = self.compute_dtype

        # 1. packed input projection (tiled, pipelined, MXU in compute dtype)
        qkv = pallas_linear(x.reshape(N * L, E_q), self.packed_w_sdpa, self.packed_b_sdpa,
                            compute_dtype=cdt, out_dtype=cdt)
        # 2. free reshape to (N, L, 3, H, Dh) — no head-split transposes; SDPA kernels
        #    consume this layout directly and emit lane-dense (N, L, E_total).
        qkv = qkv.reshape(N, L, 3, H, Dh)

        # 3. SDPA (softmax activation); scale already folded into q projection.
        if need_weights:
            attn, attn_weight = pallas_sdpa_with_weights(
                qkv, nheads=H, head_dim=Dh, out_dtype=cdt)
        else:
            attn = pallas_flash_sdpa(qkv, nheads=H, head_dim=Dh, out_dtype=cdt)
            attn_weight = None

        # 4. output projection (attn already in (N, L, E_total) layout — no merge transpose)
        out = pallas_linear(attn.reshape(N * L, E_total), self.out_w, self.out_b,
                            compute_dtype=cdt, out_dtype=jnp.float32)
        out = out.reshape(N, L, E_q)

        # TODO(synk): dropout (p=0.0 -> identity), attn_mask/is_causal, and the
        # relu/sigmoid/linear_attention activation variants are not implemented.
        return out, attn_weight


# ----------------------------- pure-JAX reference for sanity checks -----------------------------
def _reference(x, mod):
    N, L, E_q = x.shape
    H, Dh, E_total = mod.nheads, mod.E_head, mod.E_total
    qkv = x.reshape(N * L, E_q) @ mod.packed_w + mod.packed_b
    q, k, v = jnp.split(qkv.reshape(N, L, 3 * E_total), 3, axis=-1)
    sh = lambda t: jnp.transpose(t.reshape(N, L, H, Dh), (0, 2, 1, 3))
    q, k, v = sh(q), sh(k), sh(v)
    s = jnp.einsum("nhqd,nhkd->nhqk", q, k) / math.sqrt(Dh)
    p = jax.nn.softmax(s, axis=-1)
    o = jnp.einsum("nhqk,nhkd->nhqd", p, v)
    o = jnp.transpose(o, (0, 2, 1, 3)).reshape(N, L, E_total)
    out = o.reshape(N * L, E_total) @ mod.out_w + mod.out_b
    return out.reshape(N, L, E_q), p


if __name__ == "__main__":
    key = jax.random.PRNGKey(0)
    k_param, k_x1, k_x2 = jax.random.split(key, 3)

    # -------- Config A: aligned small shapes --------
    N, L, E_q, E_total, nheads = 2, 8, 32, 32, 4
    x = jax.random.normal(k_x1, (N, L, E_q), dtype=jnp.float32)

    # fp32 compute path: tight check (both weights path and fast flash path)
    mod_f32 = MyMultiHeadAttentionPallas(E_q, E_total, nheads, key=k_param,
                                         compute_dtype=jnp.float32)
    out, attn_w = mod_f32(x, need_weights=True)
    out = jax.block_until_ready(out)
    attn_w = jax.block_until_ready(attn_w)
    ref_out, ref_w = _reference(x, mod_f32)
    assert out.shape == (N, L, E_q)
    assert attn_w.shape == (N, nheads, L, L)
    assert jnp.allclose(out, ref_out, atol=1e-4, rtol=1e-4)
    assert jnp.allclose(attn_w, ref_w, atol=1e-4, rtol=1e-4)

    out_fast, no_w = mod_f32(x, need_weights=False)
    out_fast = jax.block_until_ready(out_fast)
    assert no_w is None
    assert jnp.allclose(out_fast, ref_out, atol=1e-4, rtol=1e-4)

    # bf16 compute path (default; MXU dtype): loose check vs fp32 reference
    mod_bf16 = MyMultiHeadAttentionPallas(E_q, E_total, nheads, key=k_param)
    out_bf, _ = mod_bf16(x)  # need_weights defaults to False (fast flash path)
    out_bf = jax.block_until_ready(out_bf)
    assert jnp.allclose(out_bf, ref_out, atol=1e-1, rtol=1e-1)

    # -------- Config B: unaligned L exercises padding + in-kernel kv masking --------
    N2, L2 = 1, 12
    x2 = jax.random.normal(k_x2, (N2, L2, E_q), dtype=jnp.float32)
    out2, w2 = mod_f32(x2, need_weights=True)
    out2 = jax.block_until_ready(out2)
    w2 = jax.block_until_ready(w2)
    ref_out2, ref_w2 = _reference(x2, mod_f32)
    assert out2.shape == (N2, L2, E_q)
    assert w2.shape == (N2, nheads, L2, L2)
    assert jnp.allclose(out2, ref_out2, atol=1e-4, rtol=1e-4)
    assert jnp.allclose(w2, ref_w2, atol=1e-4, rtol=1e-4)

    out2f, _ = mod_f32(x2, need_weights=False)
    out2f = jax.block_until_ready(out2f)
    assert jnp.allclose(out2f, ref_out2, atol=1e-4, rtol=1e-4)

    print("KERNEL_OK")
</pallas_src>

<mosaic_0001>
module attributes {stable_mosaic.version = 11 : i64} {
  func.func @_linear_kernel(%arg0: i32, %arg1: i32, %arg2: i32, %arg3: memref<16x128xf32, #tpu.memory_space<vmem>>, %arg4: memref<128x128xf32, #tpu.memory_space<vmem>>, %arg5: memref<1x128xf32, #tpu.memory_space<vmem>>, %arg6: memref<16x128xf32, #tpu.memory_space<vmem>>, %arg7: memref<16x128xf32, #tpu.memory_space<vmem>>) attributes {dimension_semantics = [#tpu.dimension_semantics<parallel>, #tpu.dimension_semantics<parallel>, #tpu.dimension_semantics<arbitrary>], iteration_bounds = array<i64: 1, 1, 1>, scalar_prefetch = 0 : i64, scratch_operands = 1 : i64, tpu.core_type = #tpu.core_type<tc>, window_params = [{transform_indices = @transform_0, window_bounds = array<i64: 16, 128>}, {transform_indices = @transform_1, window_bounds = array<i64: 128, 128>}, {transform_indices = @transform_2, window_bounds = array<i64: 1, 128>}, {transform_indices = @transform_3, window_bounds = array<i64: 16, 128>}]} {
    %c0_i32 = arith.constant 0 : i32
    %0 = arith.cmpi eq, %arg2, %c0_i32 : i32
    %1 = arith.extui %0 : i1 to i32
    %c0_i32_0 = arith.constant 0 : i32
    %2 = arith.cmpi ne, %1, %c0_i32_0 : i32
    scf.if %2 {
      %cst_10 = arith.constant 0.000000e+00 : f32
      %12 = vector.broadcast %cst_10 : f32 to vector<16x128xf32>
      %c0_11 = arith.constant 0 : index
      %c0_12 = arith.constant 0 : index
      %13 = vector.load %arg7[%c0_11, %c0_12] : memref<16x128xf32, #tpu.memory_space<vmem>>, vector<16x128xf32>
      tpu.vector_store %arg7[%c0_11, %c0_12], %12 {strides = array<i32>} : memref<16x128xf32, #tpu.memory_space<vmem>>, vector<16x128xf32>,
    } else {
    }
    %c0 = arith.constant 0 : index
    %c0_1 = arith.constant 0 : index
    %3 = vector.load %arg7[%c0, %c0_1] : memref<16x128xf32, #tpu.memory_space<vmem>>, vector<16x128xf32>
    %c0_2 = arith.constant 0 : index
    %c0_3 = arith.constant 0 : index
    %4 = vector.load %arg3[%c0_2, %c0_3] : memref<16x128xf32, #tpu.memory_space<vmem>>, vector<16x128xf32>
    %c0_4 = arith.constant 0 : index
    %c0_5 = arith.constant 0 : index
    %5 = vector.load %arg4[%c0_4, %c0_5] : memref<128x128xf32, #tpu.memory_space<vmem>>, vector<128x128xf32>
    %cst = arith.constant dense<0.000000e+00> : vector<16x128xf32>
    %6 = tpu.matmul %4, %5, %cst {dimension_numbers = #tpu.dot_dimension_numbers<[1], [0], [0], [1], [0, 0, 1, 1], [], []>} : vector<16x128xf32>, vector<128x128xf32>, vector<16x128xf32> -> vector<16x128xf32>
    %7 = arith.addf %3, %6 : vector<16x128xf32>
    %c0_6 = arith.constant 0 : index
    %c0_7 = arith.constant 0 : index
    %8 = vector.load %arg7[%c0_6, %c0_7] : memref<16x128xf32, #tpu.memory_space<vmem>>, vector<16x128xf32>
    tpu.vector_store %arg7[%c0_6, %c0_7], %7 {strides = array<i32>} : memref<16x128xf32, #tpu.memory_space<vmem>>, vector<16x128xf32>,
    %c0_i32_8 = arith.constant 0 : i32
    %9 = arith.cmpi eq, %arg2, %c0_i32_8 : i32
    %10 = arith.extui %9 : i1 to i32
    %c0_i32_9 = arith.constant 0 : i32
    %11 = arith.cmpi ne, %10, %c0_i32_9 : i32
    scf.if %11 {
      %c0_10 = arith.constant 0 : index
      %c0_11 = arith.constant 0 : index
      %12 = vector.load %arg7[%c0_10, %c0_11] : memref<16x128xf32, #tpu.memory_space<vmem>>, vector<16x128xf32>
      %c0_12 = arith.constant 0 : index
      %c0_13 = arith.constant 0 : index
      %13 = vector.load %arg5[%c0_12, %c0_13] : memref<1x128xf32, #tpu.memory_space<vmem>>, vector<1x128xf32>
      %14 = vector.broadcast %13 : vector<1x128xf32> to vector<16x128xf32>
      %15 = arith.addf %12, %14 : vector<16x128xf32>
      %c0_14 = arith.constant 0 : index
      %c0_15 = arith.constant 0 : index
      %16 = vector.load %arg6[%c0_14, %c0_15] : memref<16x128xf32, #tpu.memory_space<vmem>>, vector<16x128xf32>
      tpu.vector_store %arg6[%c0_14, %c0_15], %15 {strides = array<i32>} : memref<16x128xf32, #tpu.memory_space<vmem>>, vector<16x128xf32>,
    } else {
    }
    return
  }
  func.func @transform_0(%arg0: i32, %arg1: i32, %arg2: i32) -> (i32, i32) {
    %c0_i32 = arith.constant 0 : i32
    return %arg0, %arg2 : i32, i32
  }
  func.func @transform_1(%arg0: i32, %arg1: i32, %arg2: i32) -> (i32, i32) {
    %c0_i32 = arith.constant 0 : i32
    return %arg2, %arg1 : i32, i32
  }
  func.func @transform_2(%arg0: i32, %arg1: i32, %arg2: i32) -> (i32, i32) {
    %c0_i32 = arith.constant 0 : i32
    %c0_i32_0 = arith.constant 0 : i32
    return %c0_i32, %arg1 : i32, i32
  }
  func.func @transform_3(%arg0: i32, %arg1: i32, %arg2: i32) -> (i32, i32) {
    %c0_i32 = arith.constant 0 : i32
    return %arg0, %arg1 : i32, i32
  }
}

</mosaic_0001>

<bundles_post_ra>
// kernel: tpu_custom_call.1
= control target key start
LH: loop header
LB: loop body
LE: loop exit
PB: predicated region body
PF: predicated region fallthrough
CT: control target
= control target key end

     0   :  { %8 = vsyncpa [#allocation4], 0  ;;  %s418_s0 = inlined_call_operand.hbm [shape: f32[16,128], index: 0, kind: input, shape index: {}]   ;;  %s419_s1 = inlined_call_operand.hbm [shape: f32[128,128], index: 1, kind: input, shape index: {}]   ;;  %s420_s2 = inlined_call_operand.vmem [shape: f32[1,128], index: 2, kind: input, shape index: {}]   ;;  %s421_s3 = inlined_call_operand.hbm [shape: f32[16,128], index: 3, kind: output, shape index: {}]  }
   0x1   :  { %9 = vsyncpa [#allocation7], 0 }
   0x2   :  { %10 = vsyncpa [#allocation5], 0  ;;  %s345_s12 = smov [#allocation3]   ;;  %s273_s16 = scalar_lea.hbm %s418_s0, 256 }
   0x3   :  { %s16_s13 = sshll.u32 %s345_s12, 4  ;;  %p274_p0 = scmp.ne.s32.totalorder %s418_s0, %s273_s16  ;;  %s17_s13 = int_to_ptr.vmem [resolvable:$true] %s16_s13 }
   0x4   :  { %p277_p1 = scmp.lt.u32.totalorder %s273_s16, %s418_s0 }
   0x6   :  { %p279_p2 = pnand %p277_p1, %p274_p0 }
   0x8   :  { %282 = shalt.err (!%p279_p2)
}
   0x9   :  { %s283_s21 = scalar_lea.vmem %s17_s13, 256  ;;  %p288_p4 = scmp.lt.s32.totalorder %s17_s13, %s17_s13 }
   0xa   :  { %p284_p3 = scmp.ne.s32.totalorder %s17_s13, %s283_s21  ;;  %p289_p5 = scmp.lt.s32.totalorder %s283_s21, %s283_s21 }
   0xc   :  { %p290_p6 = por %p289_p5, %p288_p4 }
   0xe   :  { %p291_p7 = pnand %p290_p6, %p284_p3 }
  0x10   :  { %294 = shalt.err (!%p291_p7)
}
  0x11   :  { %s346_s22 = smov 128   ;;  %s347_s23 = smov 8  }
  0x12   :  { %22 = dma.hbm_to_vmem [thread:$0]  %s418_s0, 256, %s17_s13, [#allocation4], %s346_s22, %s346_s22, %s347_s23  }
  0x13   :  { %s348_s26 = smov [#allocation6]   ;;  %s295_s30 = scalar_lea.hbm %s419_s1, 2048 }
  0x14   :  { %s28_s27 = sshll.u32 %s348_s26, 4  ;;  %p296_p8 = scmp.ne.s32.totalorder %s419_s1, %s295_s30  ;;  %s29_s27 = int_to_ptr.vmem [resolvable:$true] %s28_s27 }
  0x15   :  { %p299_p9 = scmp.lt.u32.totalorder %s295_s30, %s419_s1 }
  0x17   :  { %p301_p10 = pnand %p299_p9, %p296_p8 }
  0x19   :  { %304 = shalt.err (!%p301_p10)
}
  0x1a   :  { %s305_s8 = scalar_lea.vmem %s29_s27, 2048  ;;  %p310_p12 = scmp.lt.s32.totalorder %s29_s27, %s29_s27 }
  0x1b   :  { %p306_p11 = scmp.ne.s32.totalorder %s29_s27, %s305_s8  ;;  %p311_p13 = scmp.lt.s32.totalorder %s305_s8, %s305_s8 }
  0x1d   :  { %p312_p0 = por %p311_p13, %p310_p12 }
  0x1f   :  { %p313_p1 = pnand %p312_p0, %p306_p11 }
  0x21   :  { %316 = shalt.err (!%p313_p1)
}
  0x22   :  { %34 = dma.hbm_to_vmem [thread:$0]  %s419_s1, 2048, %s29_s27, [#allocation7], %s346_s22, %s346_s22, %s347_s23  }
  0x23   :  { %339 = dma.done.wait [#allocation4], 256  }
  0x24   :  { %340 = vsyncadd [#allocation4], 4294967040 }
  0x25   :  { %341 = dma.done.wait [#allocation7], 2048  }
  0x26   :  { %342 = vsyncadd [#allocation7], 4294965248  ;;  %v53_v0 = vld [vmem:[#allocation6] sm:$0xff]  ;;  %v54_v1 = vld [vmem:[#allocation6 + $0x8] sm:$0xff]  ;;  %s349_s11 = smov [#allocation8]  }
  0x27   :  { %v55_v2 = vld [vmem:[#allocation6 + $0x10] sm:$0xff]  ;;  %v236_v3 = vpack.c.bf16 %v54_v1, %v53_v0  ;;  %v56_v4 = vld [vmem:[#allocation6 + $0x18] sm:$0xff]  ;;  %v57_v6 = vld [vmem:[#allocation6 + $0x20] sm:$0xff]  ;;  %s169_s12 = sshll.u32 %s349_s11, 4  ;;  %s170_s12 = int_to_ptr.vmem [resolvable:$true] %s169_s12 }
  0x28   :  { %v240_v5 = vpack.c.bf16 %v56_v4, %v55_v2  ;;  %v58_v7 = vld [vmem:[#allocation6 + $0x28] sm:$0xff]  ;;  %v51_v9 = vld [vmem:[#allocation3] sm:$0xff]  ;;  %v60_v11 = vld [vmem:[#allocation6 + $0x38] sm:$0xff]  ;;  %s317_s13 = scalar_lea.vmem %s170_s12, 256  ;;  %p322_p3 = scmp.lt.s32.totalorder %s170_s12, %s170_s12 }
  0x29   :  { %237 = vmatprep.subr.bf16.mxu0 %v236_v3  ;;  %v244_v8 = vpack.c.bf16 %v58_v7, %v57_v6  ;;  %v59_v10 = vld [vmem:[#allocation6 + $0x30] sm:$0xff]  ;;  %233 = vmatprep.mubr.f32.mxu0 %v51_v9  ;;  %v61_v13 = vld [vmem:[#allocation6 + $0x40] sm:$0xff]  ;;  %v62_v14 = vld [vmem:[#allocation6 + $0x48] sm:$0xff]  ;;  %p318_p2 = scmp.ne.s32.totalorder %s170_s12, %s317_s13  ;;  %p323_p4 = scmp.lt.s32.totalorder %s317_s13, %s317_s13 }
  0x2a   :  { %239 = vmatpush3.bf16.msra.mxu0 %v236_v3  ;;  %v248_v12 = vpack.c.bf16 %v60_v11, %v59_v10  ;;  %v252_v15 = vpack.c.bf16 %v62_v14, %v61_v13  ;;  %v63_v16 = vld [vmem:[#allocation6 + $0x50] sm:$0xff]  ;;  %v64_v17 = vld [vmem:[#allocation6 + $0x58] sm:$0xff]  ;;  %v65_v19 = vld [vmem:[#allocation6 + $0x60] sm:$0xff] }
  0x2b   :  { %241 = vmatprep.subr.bf16.mxu0 %v240_v5  ;;  %v256_v18 = vpack.c.bf16 %v64_v17, %v63_v16  ;;  %v66_v20 = vld [vmem:[#allocation6 + $0x68] sm:$0xff]  ;;  %v67_v22 = vld [vmem:[#allocation6 + $0x70] sm:$0xff]  ;;  %v68_v23 = vld [vmem:[#allocation6 + $0x78] sm:$0xff]  ;;  %p324_p5 = por %p323_p4, %p322_p3 }
  0x2c   :  { %v260_v21 = vpack.c.bf16 %v66_v20, %v65_v19  ;;  %v264_v24 = vpack.c.bf16 %v68_v23, %v67_v22  ;;  %v52_v25 = vld [vmem:[#allocation3 + $0x8] sm:$0xff]  ;;  %v182_v26 = vld [vmem:[%s420_s2] ss:$0 sm:$0xff] }
  0x2d   :  { %p325_p6 = pnand %p324_p5, %p318_p2 }
  0x2e   :  { %243 = vmatpush3.bf16.msra.mxu0 %v240_v5 }
  0x2f   :  { %245 = vmatprep.subr.bf16.mxu0 %v244_v8 }
  0x32   :  { %247 = vmatpush3.bf16.msra.mxu0 %v244_v8 }
  0x33   :  { %249 = vmatprep.subr.bf16.mxu0 %v248_v12 }
  0x36   :  { %251 = vmatpush3.bf16.msra.mxu0 %v248_v12 }
  0x37   :  { %253 = vmatprep.subr.bf16.mxu0 %v252_v15 }
  0x3a   :  { %255 = vmatpush3.bf16.msra.mxu0 %v252_v15 }
  0x3b   :  { %257 = vmatprep.subr.bf16.mxu0 %v256_v18 }
  0x3e   :  { %259 = vmatpush3.bf16.msra.mxu0 %v256_v18 }
  0x3f   :  { %261 = vmatprep.subr.bf16.mxu0 %v260_v21 }
  0x42   :  { %263 = vmatpush3.bf16.msra.mxu0 %v260_v21 }
  0x43   :  { %265 = vmatprep.subr.bf16.mxu0 %v264_v24 }
  0x46   :  { %267 = vmatpush3.bf16.msra.mxu0 %v264_v24 }
  0x49   :  { %234 = vmatmul.mubr.f32.vlgmr.msra.gmra.mrb[0].mxu0 %v52_v25 }
 0x11c   :  { %v235_v27 = vpop.f32.mrb[0].mxu0 }
 0x11d   :  { %v161_v28 = vadd.f32 %v235_v27, %v182_v26  ;;  %v135_v29 = vpop.f32.mrb[1].mxu0 }
 0x11e   :  { %v160_v30 = vadd.f32 %v182_v26, %v135_v29 }
 0x11f   :  { %163 = vst [vmem:[#allocation8 + $0x8] sm:$0xff] %v161_v28 }
 0x120   :  { %162 = vst [vmem:[#allocation8] sm:$0xff] %v160_v30 }
 0x121   :  { %328 = shalt.err (!%p325_p6)
}
 0x122   :  { %s329_s2 = scalar_lea.hbm %s421_s3, 256 }
 0x123   :  { %p330_p7 = scmp.ne.s32.totalorder %s421_s3, %s329_s2  ;;  %p333_p8 = scmp.lt.u32.totalorder %s329_s2, %s421_s3 }
 0x125   :  { %p335_p9 = pnand %p333_p8, %p330_p7 }
 0x127   :  { %338 = shalt.err (!%p335_p9)
}
 0x128   :  { %175 = dma.vmem_to_hbm [thread:$0]  %s170_s12, 256, %s421_s3, [#allocation5], %s346_s22, %s346_s22, %s347_s23  }
 0x129   :  { %343 = dma.done.wait [#allocation5], 256  }
 0x12a   :  { %344 = vsyncadd [#allocation5], 4294967040 }
 0x12b   :  { %179 = vsyncpa [#allocation4], 1 }
 0x12c   :  { %180 = vsyncpa [#allocation7], 1 }
 0x12d   :  { %181 = vsyncpa [#allocation5], 1 }

</bundles_post_ra>
